<compile_context>
chip_gen: v7x
topology: tpu7x:2x2x1
jax: 0.10.0
libtpu: 0.0.40
codegen_flags: <defaults>
</compile_context>

<pallas_src>
import functools
import math

import jax
import jax.numpy as jnp
from jax import lax
from jax.experimental import pallas as pl
from jax.experimental.pallas import tpu as pltpu


LANE = 128                      # TPU lane width
_MXU_DTYPE = jnp.bfloat16       # MXU-native input dtype (accumulation stays f32)


def _round_up(v, m):
    return (v + m - 1) // m * m


# ----------------------------------------------------------------------------
# Pallas kernel: whole-batch grouped conv1d as K-tap shifted-slice matmul accumulation
# ----------------------------------------------------------------------------
def _cconv_kernel(w_ref, x_ref, o_ref, *, taps, dilation):
    """w_ref: (K, Cout, Cin)  bf16 block-diagonal weight (2 groups fused)
       x_ref: (Cin, Lin)      f32 input, batch folded into the lane axis, zero padded
       o_ref: (Cout, L)       f32 stride-1 dense output, lane-dense (L % 128 == 0)
    """
    L = o_ref.shape[1]
    x = x_ref[...].astype(_MXU_DTYPE)              # one VPU cast, reused by every tap
    acc = jnp.zeros(o_ref.shape, jnp.float32)
    for k in range(taps):                          # static unroll, K is small
        off = k * dilation
        acc += jnp.dot(w_ref[k], x[:, off:off + L],
                       preferred_element_type=jnp.float32)
    o_ref[...] = acc


# ----------------------------------------------------------------------------
# Wrapper: ComplexConv1d.forward
# ----------------------------------------------------------------------------
def complex_conv1d(x, A, B, *, in_channels, padding=0, stride=1, dilation=1):
    """x: (N, Cin, T) f32,  A/B: (Cout, Cin//2, K) f32  ->  (N, Cout, T_out) f32."""
    N, Cin, T = x.shape
    Cout, Cin_g, K = A.shape
    assert Cin == in_channels and Cin_g * 2 == Cin and Cout % 2 == 0

    # --- fold real + "idea" parts into one effective weight (exact PyTorch slicing quirk) ---
    spl = in_channels // 2
    sign = jnp.ones((Cout,), jnp.float32).at[:spl].set(-1.0)
    w_eff = A + B * sign[:, None, None]                              # (Cout, Cin/2, K)

    # --- fuse the two conv groups into ONE matmul via a block-diagonal weight ---
    wbd = jnp.zeros((Cout, Cin, K), jnp.float32)
    wbd = wbd.at[:Cout // 2, :Cin // 2, :].set(w_eff[:Cout // 2])
    wbd = wbd.at[Cout // 2:, Cin // 2:, :].set(w_eff[Cout // 2:])
    w_taps = jnp.transpose(wbd, (2, 0, 1)).astype(_MXU_DTYPE)        # (K, Cout, Cin)

    # --- reflect pad, then fold batch into the 128-lane time axis ---
    if padding:
        x = jnp.pad(x, ((0, 0), (0, 0), (padding, padding)), mode='reflect')
    Tp = T + 2 * padding
    Ke = (K - 1) * dilation + 1                  # effective (dilated) kernel extent
    T_dense = Tp - Ke + 1                        # stride-1 output length
    T_out = (Tp - Ke) // stride + 1              # final output length

    T_blk = _round_up(Tp, LANE)                  # per-batch lane segment (>= Tp)
    L = N * T_blk                                # lane-dense output width
    extra = _round_up(Ke - 1, LANE) if Ke > 1 else 0
    Lin = L + extra                              # room for the tap shifts of the last batch

    xb = jnp.pad(x, ((0, 0), (0, 0), (0, T_blk - Tp)))               # (N, Cin, T_blk)
    x2d = jnp.transpose(xb, (1, 0, 2)).reshape(Cin, L)               # batch -> lanes
    if extra:
        x2d = jnp.pad(x2d, ((0, 0), (0, extra)))

    kernel = functools.partial(_cconv_kernel, taps=K, dilation=dilation)
    out2d = pl.pallas_call(
        kernel,
        out_shape=jax.ShapeDtypeStruct((Cout, L), jnp.float32),
        grid=(1,),
        in_specs=[
            pl.BlockSpec((K, Cout, Cin), lambda i: (0, 0, 0)),       # weight stays resident
            pl.BlockSpec((Cin, Lin), lambda i: (0, 0)),
        ],
        out_specs=pl.BlockSpec((Cout, L), lambda i: (0, 0)),
        compiler_params=pltpu.CompilerParams(
            dimension_semantics=("arbitrary",),
            vmem_limit_bytes=32 * 1024 * 1024,
        ),
    )(w_taps, x2d)

    # --- unfold lanes back to (N, Cout, T_out) ---
    y = out2d.reshape(Cout, N, T_blk).transpose(1, 0, 2)[:, :, :T_dense]
    if stride > 1:
        # TODO(synk): stride > 1 is handled by subsampling the dense stride-1 output
        # (correct, but performs stride-times extra MXU work).
        y = y[:, :, ::stride]
    return y[:, :, :T_out]


# ----------------------------------------------------------------------------
# Pure-JAX reference (exact PyTorch forward in f32) — used only for validation
# ----------------------------------------------------------------------------
def complex_conv1d_reference(x, A, B, *, in_channels, padding=0, stride=1, dilation=1):
    if padding:
        x = jnp.pad(x, ((0, 0), (0, 0), (padding, padding)), mode='reflect')
    spl = in_channels // 2
    weight_B = jnp.concatenate([B[:spl] * -1.0, B[spl:]], axis=0)
    dn = lax.conv_dimension_numbers(x.shape, A.shape, ('NCH', 'OIH', 'NCH'))
    conv = functools.partial(
        lax.conv_general_dilated, window_strides=(stride,), padding='VALID',
        rhs_dilation=(dilation,), dimension_numbers=dn, feature_group_count=2)
    return conv(x, A) + conv(x, weight_B)


# ----------------------------------------------------------------------------
# Parameter init (matches _ComplexConvNd.reset_parameters)
# ----------------------------------------------------------------------------
def init_complex_weights(key, in_ch, out_ch, kernel_size):
    shape = (out_ch, in_ch // 2, kernel_size)
    fan_in = shape[1] * kernel_size
    gain = math.sqrt(2.0)                                  # calculate_gain('leaky_relu', 0)
    bound = math.sqrt(3.0) * gain / math.sqrt(fan_in)
    kA, kB = jax.random.split(key)
    A = jax.random.uniform(kA, shape, jnp.float32,
                           -bound / (math.pi ** 2), bound / (math.pi ** 2))
    B = jax.random.uniform(kB, shape, jnp.float32, -1.0 / math.pi, 1.0 / math.pi)
    return A, B


# ----------------------------------------------------------------------------
# Main
# ----------------------------------------------------------------------------
if __name__ == "__main__":
    key = jax.random.PRNGKey(0)

    configs = [
        dict(batch=2, in_channels=32, out_channels=32, kernel_size=5, padding=2, T=64),
        dict(batch=2, in_channels=16, out_channels=64, kernel_size=3, padding=1, T=50),
    ]

    for idx, cfg in enumerate(configs):
        k = jax.random.fold_in(key, idx)
        kx, kw = jax.random.split(k)
        x = jax.random.normal(kx, (cfg['batch'], cfg['in_channels'], cfg['T']), jnp.float32)
        A, B = init_complex_weights(kw, cfg['in_channels'], cfg['out_channels'],
                                    cfg['kernel_size'])

        fn = jax.jit(functools.partial(
            complex_conv1d, in_channels=cfg['in_channels'], padding=cfg['padding']))
        y = jax.block_until_ready(fn(x, A, B))

        y_ref = complex_conv1d_reference(
            x, A, B, in_channels=cfg['in_channels'], padding=cfg['padding'])

        expected_T = cfg['T'] + 2 * cfg['padding'] - cfg['kernel_size'] + 1
        assert y.shape == (cfg['batch'], cfg['out_channels'], expected_T), y.shape
        assert y.shape == y_ref.shape
        assert bool(jnp.all(jnp.isfinite(y)))
        err = float(jnp.max(jnp.abs(y - y_ref)))
        scale = float(jnp.max(jnp.abs(y_ref))) + 1e-6
        # bf16 MXU inputs with f32 accumulation -> small rounding error vs the f32 reference
        assert err <= 0.02 * scale + 1e-3, (err, scale)

    print("KERNEL_OK")
</pallas_src>

<mosaic_0001>
module attributes {stable_mosaic.version = 11 : i64} {
  func.func @_cconv_kernel(%arg0: i32, %arg1: memref<5x32x32xbf16, #tpu.memory_space<vmem>>, %arg2: memref<32x384xf32, #tpu.memory_space<vmem>>, %arg3: memref<32x256xf32, #tpu.memory_space<vmem>>) attributes {dimension_semantics = [#tpu.dimension_semantics<arbitrary>], iteration_bounds = array<i64: 1>, scalar_prefetch = 0 : i64, scratch_operands = 0 : i64, tpu.core_type = #tpu.core_type<tc>, window_params = [{pipeline_mode = #tpu.pipeline_mode<synchronous>, transform_indices = @transform_0, window_bounds = array<i64: 5, 32, 32>}, {pipeline_mode = #tpu.pipeline_mode<synchronous>, transform_indices = @transform_1, window_bounds = array<i64: 32, 384>}, {pipeline_mode = #tpu.pipeline_mode<synchronous>, transform_indices = @transform_2, window_bounds = array<i64: 32, 256>}]} {
    %c0 = arith.constant 0 : index
    %c0_0 = arith.constant 0 : index
    %0 = vector.load %arg2[%c0, %c0_0] : memref<32x384xf32, #tpu.memory_space<vmem>>, vector<32x384xf32>
    %1 = arith.truncf %0 : vector<32x384xf32> to vector<32x384xbf16>
    %cst = arith.constant 0.000000e+00 : f32
    %2 = vector.broadcast %cst : f32 to vector<32x256xf32>
    %c0_1 = arith.constant 0 : index
    %c0_2 = arith.constant 0 : index
    %c0_3 = arith.constant 0 : index
    %3 = vector.load %arg1[%c0_1, %c0_2, %c0_3] : memref<5x32x32xbf16, #tpu.memory_space<vmem>>, vector<1x32x32xbf16>
    %4 = vector.shape_cast %3 : vector<1x32x32xbf16> to vector<32x32xbf16>
    %5 = vector.extract_strided_slice %1 {offsets = [0, 0], sizes = [32, 256], strides = [1, 1]} : vector<32x384xbf16> to vector<32x256xbf16>
    %cst_4 = arith.constant dense<0.000000e+00> : vector<32x256xf32>
    %6 = tpu.matmul %4, %5, %cst_4 {dimension_numbers = #tpu.dot_dimension_numbers<[1], [0], [0], [1], [0, 0, 1, 1], [], []>} : vector<32x32xbf16>, vector<32x256xbf16>, vector<32x256xf32> -> vector<32x256xf32>
    %7 = arith.addf %2, %6 : vector<32x256xf32>
    %c1 = arith.constant 1 : index
    %c0_5 = arith.constant 0 : index
    %c0_6 = arith.constant 0 : index
    %8 = vector.load %arg1[%c1, %c0_5, %c0_6] : memref<5x32x32xbf16, #tpu.memory_space<vmem>>, vector<1x32x32xbf16>
    %9 = vector.shape_cast %8 : vector<1x32x32xbf16> to vector<32x32xbf16>
    %10 = vector.extract_strided_slice %1 {offsets = [0, 1], sizes = [32, 256], strides = [1, 1]} : vector<32x384xbf16> to vector<32x256xbf16>
    %cst_7 = arith.constant dense<0.000000e+00> : vector<32x256xf32>
    %11 = tpu.matmul %9, %10, %cst_7 {dimension_numbers = #tpu.dot_dimension_numbers<[1], [0], [0], [1], [0, 0, 1, 1], [], []>} : vector<32x32xbf16>, vector<32x256xbf16>, vector<32x256xf32> -> vector<32x256xf32>
    %12 = arith.addf %7, %11 : vector<32x256xf32>
    %c2 = arith.constant 2 : index
    %c0_8 = arith.constant 0 : index
    %c0_9 = arith.constant 0 : index
    %13 = vector.load %arg1[%c2, %c0_8, %c0_9] : memref<5x32x32xbf16, #tpu.memory_space<vmem>>, vector<1x32x32xbf16>
    %14 = vector.shape_cast %13 : vector<1x32x32xbf16> to vector<32x32xbf16>
    %15 = vector.extract_strided_slice %1 {offsets = [0, 2], sizes = [32, 256], strides = [1, 1]} : vector<32x384xbf16> to vector<32x256xbf16>
    %cst_10 = arith.constant dense<0.000000e+00> : vector<32x256xf32>
    %16 = tpu.matmul %14, %15, %cst_10 {dimension_numbers = #tpu.dot_dimension_numbers<[1], [0], [0], [1], [0, 0, 1, 1], [], []>} : vector<32x32xbf16>, vector<32x256xbf16>, vector<32x256xf32> -> vector<32x256xf32>
    %17 = arith.addf %12, %16 : vector<32x256xf32>
    %c3 = arith.constant 3 : index
    %c0_11 = arith.constant 0 : index
    %c0_12 = arith.constant 0 : index
    %18 = vector.load %arg1[%c3, %c0_11, %c0_12] : memref<5x32x32xbf16, #tpu.memory_space<vmem>>, vector<1x32x32xbf16>
    %19 = vector.shape_cast %18 : vector<1x32x32xbf16> to vector<32x32xbf16>
    %20 = vector.extract_strided_slice %1 {offsets = [0, 3], sizes = [32, 256], strides = [1, 1]} : vector<32x384xbf16> to vector<32x256xbf16>
    %cst_13 = arith.constant dense<0.000000e+00> : vector<32x256xf32>
    %21 = tpu.matmul %19, %20, %cst_13 {dimension_numbers = #tpu.dot_dimension_numbers<[1], [0], [0], [1], [0, 0, 1, 1], [], []>} : vector<32x32xbf16>, vector<32x256xbf16>, vector<32x256xf32> -> vector<32x256xf32>
    %22 = arith.addf %17, %21 : vector<32x256xf32>
    %c4 = arith.constant 4 : index
    %c0_14 = arith.constant 0 : index
    %c0_15 = arith.constant 0 : index
    %23 = vector.load %arg1[%c4, %c0_14, %c0_15] : memref<5x32x32xbf16, #tpu.memory_space<vmem>>, vector<1x32x32xbf16>
    %24 = vector.shape_cast %23 : vector<1x32x32xbf16> to vector<32x32xbf16>
    %25 = vector.extract_strided_slice %1 {offsets = [0, 4], sizes = [32, 256], strides = [1, 1]} : vector<32x384xbf16> to vector<32x256xbf16>
    %cst_16 = arith.constant dense<0.000000e+00> : vector<32x256xf32>
    %26 = tpu.matmul %24, %25, %cst_16 {dimension_numbers = #tpu.dot_dimension_numbers<[1], [0], [0], [1], [0, 0, 1, 1], [], []>} : vector<32x32xbf16>, vector<32x256xbf16>, vector<32x256xf32> -> vector<32x256xf32>
    %27 = arith.addf %22, %26 : vector<32x256xf32>
    %c0_17 = arith.constant 0 : index
    %c0_18 = arith.constant 0 : index
    %28 = vector.load %arg3[%c0_17, %c0_18] : memref<32x256xf32, #tpu.memory_space<vmem>>, vector<32x256xf32>
    tpu.vector_store %arg3[%c0_17, %c0_18], %27 {strides = array<i32>} : memref<32x256xf32, #tpu.memory_space<vmem>>, vector<32x256xf32>,
    return
  }
  func.func @transform_0(%arg0: i32) -> (i32, i32, i32) {
    %c0_i32 = arith.constant 0 : i32
    %c0_i32_0 = arith.constant 0 : i32
    %c0_i32_1 = arith.constant 0 : i32
    %c0_i32_2 = arith.constant 0 : i32
    return %c0_i32, %c0_i32_0, %c0_i32_1 : i32, i32, i32
  }
  func.func @transform_1(%arg0: i32) -> (i32, i32) {
    %c0_i32 = arith.constant 0 : i32
    %c0_i32_0 = arith.constant 0 : i32
    %c0_i32_1 = arith.constant 0 : i32
    return %c0_i32, %c0_i32_0 : i32, i32
  }
  func.func @transform_2(%arg0: i32) -> (i32, i32) {
    %c0_i32 = arith.constant 0 : i32
    %c0_i32_0 = arith.constant 0 : i32
    %c0_i32_1 = arith.constant 0 : i32
    return %c0_i32, %c0_i32_0 : i32, i32
  }
}

</mosaic_0001>

<bundles_post_ra>
// kernel: complex_conv1d.1
= control target key start
LH: loop header
LB: loop body
LE: loop exit
PB: predicated region body
PF: predicated region fallthrough
CT: control target
= control target key end

     0   :  { %s613_s17 = smov 126   ;;  %s614_s18 = smov 127   ;;  %v615_v15 = vmov 0   ;;  %vm67_vm0 = vcmask 1039360   ;;  %vm232_vm1 = vcmask 1031168   ;;  %vm76_vm2 = vcmask 261120   ;;  %s787_s1 = inlined_call_operand.vmem [shape: f32[32,384], index: 1, kind: input, shape index: {}]   ;;  %s788_s0 = inlined_call_operand.vmem [shape: bf16[5,32,32], index: 0, kind: input, shape index: {}]   ;;  %s789_s2 = inlined_call_operand.vmem [shape: f32[32,256], index: 2, kind: output, shape index: {}]  }
   0x1   :  { %v13_v0 = vld [vmem:[%s787_s1 + $0x8] sm:$0xff]  ;;  %v16_v1 = vld [vmem:[%s787_s1 + $0x20] sm:$0xff]  ;;  %v14_v2 = vld [vmem:[%s787_s1 + $0x10] sm:$0xff]  ;;  %115 = vmatprep.mubr.bf16.mxu1 %v615_v15  ;;  %279 = vmatprep.mubr.bf16.mxu0 %v615_v15  ;;  %s616_s7 = smov 125   ;;  %vm335_vm3 = vcmask 1022976   ;;  %vm438_vm4 = vcmask 1014784  }
   0x2   :  { %v642_v3 = vpack.c.bf16 %v16_v1, %v13_v0  ;;  %v17_v4 = vld [vmem:[%s787_s1 + $0x28] sm:$0xff]  ;;  %v12_v6 = vld [vmem:[%s787_s1] sm:$0xff]  ;;  %v15_v7 = vld [vmem:[%s787_s1 + $0x18] sm:$0xff] }
   0x3   :  { %v26_v5 = vpack.c.bf16 %v17_v4, %v14_v2  ;;  %v655_v8 = vpack.c.bf16 %v15_v7, %v12_v6  ;;  %v20_v9 = vld [vmem:[%s787_s1 + $0x40] sm:$0xff]  ;;  %v23_v10 = vld [vmem:[%s787_s1 + $0x58] sm:$0xff]  ;;  %v22_v12 = vld [vmem:[%s787_s1 + $0x50] sm:$0xff] }
   0x4   :  { %222 = vrot.lane.b32.xlu1 %v642_v3, %s613_s17  ;;  %57 = vrot.lane.b32.xlu0 %v642_v3, %s614_s18  ;;  %v19_v11 = vld [vmem:[%s787_s1 + $0x38] sm:$0xff]  ;;  %v29_v13 = vpack.c.bf16 %v23_v10, %v20_v9  ;;  %v18_v16 = vld [vmem:[%s787_s1 + $0x30] sm:$0xff] }
   0x5   :  { %v671_v14 = vpack.c.bf16 %v22_v12, %v19_v11  ;;  %v21_v17 = vld [vmem:[%s787_s1 + $0x48] sm:$0xff]  ;;  %s617_s1 = smov 124   ;;  %v603_v39 = vld [vmem:[%s788_s0 + $0x10] sm:$0xff]   ;;  %v604_v40 = vld [vmem:[%s788_s0 + $0x20] sm:$0xff]  }
   0x6   :  { %v683_v18 = vpack.c.bf16 %v21_v17, %v18_v16  ;;  %v605_v47 = vld [vmem:[%s788_s0 + $0x18] sm:$0xff]   ;;  %v606_v52 = vld [vmem:[%s788_s0 + $0x30] sm:$0xff]   ;;  %v607_v56 = vld [vmem:[%s788_s0] sm:$0xff]  }
   0x7   :  { %v608_v60 = vld [vmem:[%s788_s0 + $0x38] sm:$0xff]   ;;  %v609_v1 = vld [vmem:[%s788_s0 + $0x8] sm:$0xff]   ;;  %v610_v2 = vld [vmem:[%s788_s0 + $0x40] sm:$0xff]  }
   0x8   :  { %224 = vrot.lane.b32.xlu1 %v26_v5, %s613_s17  ;;  %59 = vrot.lane.b32.xlu0 %v26_v5, %s614_s18  ;;  %v612_v4 = vld [vmem:[%s788_s0 + $0x48] sm:$0xff]  }
   0xc   :  { %220 = vrot.lane.b32.xlu1 %v655_v8, %s613_s17  ;;  %55 = vrot.lane.b32.xlu0 %v655_v8, %s614_s18 }
  0x10   :  { %65 = vrot.lane.b32.xlu1 %v29_v13, %s614_s18  ;;  %63 = vrot.lane.b32.xlu0 %v671_v14, %s614_s18 }
  0x14   :  { %230 = vrot.lane.b32.xlu1 %v29_v13, %s613_s17  ;;  %228 = vrot.lane.b32.xlu0 %v671_v14, %s613_s17 }
  0x18   :  { %226 = vrot.lane.b32.xlu1 %v683_v18, %s613_s17  ;;  %61 = vrot.lane.b32.xlu0 %v683_v18, %s614_s18 }
  0x1c   :  { %327 = vrot.lane.b32.xlu1 %v26_v5, %s616_s7  ;;  %325 = vrot.lane.b32.xlu0 %v642_v3, %s616_s7 }
  0x20   :  { %331 = vrot.lane.b32.xlu1 %v671_v14, %s616_s7  ;;  %323 = vrot.lane.b32.xlu0 %v655_v8, %s616_s7 }
  0x24   :  { %329 = vrot.lane.b32.xlu1 %v683_v18, %s616_s7  ;;  %333 = vrot.lane.b32.xlu0 %v29_v13, %s616_s7 }
  0x28   :  { %430 = vrot.lane.b32.xlu1 %v26_v5, %s617_s1  ;;  %428 = vrot.lane.b32.xlu0 %v642_v3, %s617_s1 }
  0x2c   :  { %434 = vrot.lane.b32.xlu1 %v671_v14, %s617_s1  ;;  %426 = vrot.lane.b32.xlu0 %v655_v8, %s617_s1 }
  0x30   :  { %432 = vrot.lane.b32.xlu1 %v683_v18, %s617_s1  ;;  %436 = vrot.lane.b32.xlu0 %v29_v13, %s617_s1 }
  0x76   :  { %v223_v19 = vpop.permute.xlu1 %222  ;;  %v58_v20 = vpop.permute.xlu0 %57 }
  0x7a   :  { %v225_v21 = vpop.permute.xlu1 %224  ;;  %v60_v22 = vpop.permute.xlu0 %59 }
  0x7b   :  { %v69_v23 = vsel %vm67_vm0, %v58_v20, %v60_v22  ;;  %v234_v24 = vsel %vm232_vm1, %v223_v19, %v225_v21 }
  0x7c   :  { %83 = vmatprep.subr.bf16.mxu1 %v69_v23  ;;  %247 = vmatprep.subr.bf16.mxu0 %v234_v24 }
  0x7e   :  { %v221_v25 = vpop.permute.xlu1 %220  ;;  %v56_v26 = vpop.permute.xlu0 %55 }
  0x7f   :  { %v68_v27 = vsel %vm67_vm0, %v56_v26, %v58_v20  ;;  %v233_v28 = vsel %vm232_vm1, %v221_v25, %v223_v19 }
  0x80   :  { %84 = vmatpush1.bf16.msra.mxu1 %v68_v27  ;;  %248 = vmatpush1.bf16.msra.mxu0 %v233_v28 }
  0x82   :  { %v66_v29 = vpop.permute.xlu1 %65  ;;  %v64_v30 = vpop.permute.xlu0 %63 }
  0x83   :  { %v71_v31 = vsel %vm67_vm0, %v64_v30, %v66_v29 }
  0x84   :  { %85 = vmatprep.subr.bf16.mxu1 %v71_v31 }
  0x86   :  { %v231_v32 = vpop.permute.xlu1 %230  ;;  %v229_v33 = vpop.permute.xlu0 %228 }
  0x87   :  { %v236_v34 = vsel %vm232_vm1, %v229_v33, %v231_v32 }
  0x88   :  { %249 = vmatprep.subr.bf16.mxu0 %v236_v34 }
  0x8a   :  { %v227_v35 = vpop.permute.xlu1 %226  ;;  %v62_v36 = vpop.permute.xlu0 %61 }
  0x8b   :  { %v70_v37 = vsel %vm67_vm0, %v62_v36, %v64_v30  ;;  %v235_v38 = vsel %vm232_vm1, %v227_v35, %v229_v33 }
  0x8c   :  { %86 = vmatpush1.bf16.msra.mxu1 %v70_v37  ;;  %250 = vmatpush1.bf16.msra.mxu0 %v235_v38 }
  0x8d   :  { %152 = vmatprep.subr.bf16.mxu1 %v642_v3  ;;  %v611_v3 = vld [vmem:[%s788_s0 + $0x28] sm:$0xff]  }
  0x8e   :  { %v328_v41 = vpop.permute.xlu1 %327  ;;  %v326_v42 = vpop.permute.xlu0 %325 }
  0x8f   :  { %532 = vmatmul.mubr.msk.bf16.vlgmr.msra.gmra.mrb[0].mxu1 %vm76_vm2, %v603_v39  ;;  %544 = vmatmul.mubr.msk.bf16.vlgmr.msra.gmra.mrb[0].mxu0 %vm76_vm2, %v604_v40  ;;  %v337_v43 = vsel %vm335_vm3, %v326_v42, %v328_v41 }
  0x90   :  { %153 = vmatpush1.bf16.msra.mxu1 %v655_v8  ;;  %350 = vmatprep.subr.bf16.mxu0 %v337_v43 }
  0x91   :  { %154 = vmatprep.subr.bf16.mxu1 %v671_v14  ;;  %125 = vmatprep.mubr.bf16.mxu1 %v615_v15 }
  0x92   :  { %v332_v44 = vpop.permute.xlu1 %331  ;;  %v324_v45 = vpop.permute.xlu0 %323  ;;  %382 = vmatprep.mubr.bf16.mxu0 %v615_v15 }
  0x93   :  { %v336_v46 = vsel %vm335_vm3, %v324_v45, %v326_v42 }
  0x94   :  { %155 = vmatpush1.bf16.msra.mxu1 %v683_v18  ;;  %351 = vmatpush1.bf16.msra.mxu0 %v336_v46 }
  0x95   :  { %562 = vmatprep.subr.bf16.mxu1 %v234_v24 }
  0x96   :  { %v330_v48 = vpop.permute.xlu1 %329  ;;  %v334_v49 = vpop.permute.xlu0 %333 }
  0x97   :  { %v338_v50 = vsel %vm335_vm3, %v330_v48, %v332_v44  ;;  %533 = vmatmul.mubr.msk.bf16.gmra.mrb[4].mxu1 %vm76_vm2, %v605_v47  ;;  %v339_v51 = vsel %vm335_vm3, %v332_v44, %v334_v49 }
  0x98   :  { %352 = vmatprep.subr.bf16.mxu0 %v339_v51  ;;  %184 = vmatprep.mubr.bf16.mxu1 %v615_v15 }
  0x99   :  { %353 = vmatpush1.bf16.msra.mxu0 %v338_v50 }
  0x9a   :  { %v431_v53 = vpop.permute.xlu1 %430  ;;  %v429_v54 = vpop.permute.xlu0 %428 }
  0x9b   :  { %v440_v55 = vsel %vm438_vm4, %v429_v54, %v431_v53 }
  0x9c   :  { %552 = vmatmul.mubr.msk.bf16.vlgmr.msra.gmra.mrb[0].mxu0 %vm76_vm2, %v606_v52  ;;  %453 = vmatprep.subr.bf16.mxu0 %v440_v55 }
  0x9d   :  { %392 = vmatprep.mubr.bf16.mxu0 %v615_v15 }
  0x9e   :  { %v435_v57 = vpop.permute.xlu1 %434  ;;  %v427_v58 = vpop.permute.xlu0 %426 }
  0x9f   :  { %v439_v59 = vsel %vm438_vm4, %v427_v58, %v429_v54  ;;  %536 = vmatmul.mubr.msk.bf16.vlgmr.msra.gmra.mrb[0].mxu1 %vm76_vm2, %v607_v56 }
  0xa0   :  { %564 = vmatpush1.bf16.msra.mxu1 %v233_v28  ;;  %454 = vmatpush1.bf16.msra.mxu0 %v439_v59 }
  0xa1   :  { %563 = vmatprep.subr.bf16.mxu1 %v236_v34  ;;  %194 = vmatprep.mubr.bf16.mxu1 %v615_v15 }
  0xa2   :  { %v433_v61 = vpop.permute.xlu1 %432  ;;  %v437_v62 = vpop.permute.xlu0 %436 }
  0xa3   :  { %v441_v63 = vsel %vm438_vm4, %v433_v61, %v435_v57  ;;  %v442_v0 = vsel %vm438_vm4, %v435_v57, %v437_v62 }
  0xa4   :  { %565 = vmatpush1.bf16.msra.mxu1 %v235_v38  ;;  %553 = vmatmul.mubr.msk.bf16.gmra.mrb[4].mxu0 %vm76_vm2, %v608_v60 }
  0xa5   :  { %455 = vmatprep.subr.bf16.mxu0 %v442_v0  ;;  %485 = vmatprep.mubr.bf16.mxu0 %v615_v15 }
  0xa6   :  { %456 = vmatpush1.bf16.msra.mxu0 %v441_v63 }
  0xa7   :  { %537 = vmatmul.mubr.msk.bf16.gmra.mrb[4].mxu1 %vm76_vm2, %v609_v1 }
  0xa8   :  { %289 = vmatprep.mubr.bf16.mxu1 %v615_v15 }
  0xac   :  { %560 = vmatmul.mubr.msk.bf16.vlgmr.msra.gmra.mrb[0].mxu0 %vm76_vm2, %v610_v2 }
  0xad   :  { %495 = vmatprep.mubr.bf16.mxu0 %v615_v15 }
  0xb3   :  { %545 = vmatmul.mubr.msk.bf16.vlgmr.msra.gmra.mrb[4].mxu1 %vm76_vm2, %v611_v3 }
  0xb4   :  { %561 = vmatmul.mubr.msk.bf16.gmra.mrb[4].mxu0 %vm76_vm2, %v612_v4 }
 0x172   :  { %v186_v5 = vpop.f32.mrb[0].mxu1 }
 0x173   :  { %v188_v6 = vpop.f32.mrb[1].mxu1 }
 0x174   :  { %v190_v7 = vpop.f32.mrb[2].mxu1 }
 0x175   :  { %v192_v8 = vpop.f32.mrb[3].mxu1 }
 0x17f   :  { %v487_v9 = vpop.f32.mrb[0].mxu0 }
 0x180   :  { %v566_v10 = vadd.f32 %v487_v9, %v186_v5  ;;  %v489_v11 = vpop.f32.mrb[1].mxu0 }
 0x181   :  { %v567_v12 = vadd.f32 %v489_v11, %v188_v6  ;;  %v491_v13 = vpop.f32.mrb[2].mxu0 }
 0x182   :  { %514 = vst [vmem:[%s789_s2] sm:$0xff] %v566_v10  ;;  %v568_v14 = vadd.f32 %v491_v13, %v190_v7  ;;  %v493_v15 = vpop.f32.mrb[3].mxu0 }
 0x183   :  { %515 = vst [vmem:[%s789_s2 + $0x8] sm:$0xff] %v567_v12  ;;  %v569_v16 = vadd.f32 %v493_v15, %v192_v8 }
 0x184   :  { %516 = vst [vmem:[%s789_s2 + $0x10] sm:$0xff] %v568_v14 }
 0x185   :  { %517 = vst [vmem:[%s789_s2 + $0x18] sm:$0xff] %v569_v16 }
 0x186   :  { %v291_v17 = vpop.f32.mrb[4].mxu1 }
 0x187   :  { %v293_v18 = vpop.f32.mrb[5].mxu1  ;;  %v497_v19 = vpop.f32.mrb[4].mxu0 }
 0x188   :  { %v570_v20 = vadd.f32 %v497_v19, %v291_v17  ;;  %v295_v21 = vpop.f32.mrb[6].mxu1  ;;  %v499_v22 = vpop.f32.mrb[5].mxu0 }
 0x189   :  { %v571_v23 = vadd.f32 %v499_v22, %v293_v18  ;;  %v297_v24 = vpop.f32.mrb[7].mxu1  ;;  %v501_v25 = vpop.f32.mrb[6].mxu0 }
 0x18a   :  { %518 = vst [vmem:[%s789_s2 + $0x20] sm:$0xff] %v570_v20  ;;  %v572_v26 = vadd.f32 %v501_v25, %v295_v21  ;;  %v503_v27 = vpop.f32.mrb[7].mxu0 }
 0x18b   :  { %519 = vst [vmem:[%s789_s2 + $0x28] sm:$0xff] %v571_v23  ;;  %v573_v28 = vadd.f32 %v503_v27, %v297_v24 }
 0x18c   :  { %520 = vst [vmem:[%s789_s2 + $0x30] sm:$0xff] %v572_v26 }
 0x18d   :  { %521 = vst [vmem:[%s789_s2 + $0x38] sm:$0xff] %v573_v28 }

</bundles_post_ra>
